<compile_context>
chip_gen: v7x
topology: tpu7x:2x2x1
jax: 0.10.0
libtpu: 0.0.40
codegen_flags: <defaults>
</compile_context>

<pallas_src>
import functools

import jax
import jax.numpy as jnp
from jax import lax
from jax.experimental import pallas as pl
from jax.experimental.pallas import tpu as pltpu


ONEHOT_MAX_V = 2048            # max vocab for the one-hot MXU gather path


def _round_up(x, m):
    return ((x + m - 1) // m) * m


# ---------------------------------------------------------------------------
# Mask constraining (mirrors Constrainer.forward); always computed in f32.
# ---------------------------------------------------------------------------
def _constrain(masks, constrain_mode):
    masks = [jnp.asarray(m).astype(jnp.float32) for m in masks]
    if constrain_mode == "identity":
        return masks
    if constrain_mode == "01":
        return [jax.nn.sigmoid(m) for m in masks]
    if constrain_mode == "-11":
        return [jnp.tanh(m) for m in masks]
    if constrain_mode == "cosine":
        return [0.5 - jnp.cos(jnp.pi * m) / 2.0 for m in masks]
    if constrain_mode == "sum1":
        s = sum(masks)
        eps = 1e-12
        # Sign-preserving floor (previous version flipped the sign of small
        # negative sums).
        s = jnp.where(jnp.abs(s) < eps, jnp.where(s < 0, -eps, eps), s)
        return [m / s for m in masks]
    # TODO(synk): 'spherical' (SLERP) constraint needs precomputed theta_0
    # statistics from the embedding weights; not implemented here.
    raise ValueError(f"Unsupported constrain_mode: {constrain_mode}")


def _vmem_budgets():
    """Generation-aware VMEM budgets (v5e/v6e: 128 MiB, v7x: 64 MiB/core)."""
    try:
        cap = int(getattr(pltpu.get_tpu_info(), "vmem_capacity_bytes", 0))
    except Exception:
        cap = 0
    if not cap or cap <= 0:
        cap = 64 * 1024 * 1024             # conservative fallback (v7x per-core)
    resident_budget = cap * 5 // 8         # ~40 MiB (v7x) / ~80 MiB (v5e/v6e)
    vmem_limit = cap * 3 // 4              # ~48 MiB (v7x) / ~96 MiB (v5e/v6e)
    return int(resident_budget), int(vmem_limit)


# ---------------------------------------------------------------------------
# Path A: one-hot MXU gather from a VMEM-resident merged table (small V,
# 16-bit tables).  ids arrive as a (tq, 1) VMEM block -> zero scalar reads.
# ---------------------------------------------------------------------------
def _onehot_gather_kernel(ids_ref, w_ref, out_ref, *, v):
    ids = ids_ref[...]                                        # (tq, 1) int32
    iota = lax.broadcasted_iota(jnp.int32, (ids.shape[0], v), 1)
    onehot = (iota == ids).astype(w_ref.dtype)                # (tq, V)
    out_ref[...] = jnp.dot(onehot, w_ref[...],
                           preferred_element_type=jnp.float32
                           ).astype(out_ref.dtype)


# ---------------------------------------------------------------------------
# Path B: VMEM-resident merged table, row-copy gather unrolled by 8.
# ---------------------------------------------------------------------------
def _vmem_copy_gather_kernel(ids_ref, w_ref, out_ref, *, tq, unroll=8):
    base = pl.program_id(0) * tq

    def body(i, carry):
        t0 = pl.multiple_of(i * unroll, unroll)
        for u in range(unroll):                               # static unroll
            t = t0 + u
            rid = ids_ref[base + t]                           # SMEM scalar read
            out_ref[pl.ds(t, 1), :] = w_ref[pl.ds(rid, 1), :]
        return carry

    lax.fori_loop(0, tq // unroll, body, 0)


# ---------------------------------------------------------------------------
# Path C: tables stay in HBM; manual per-token row DMAs (two tables) into
# (tq, D) VMEM tiles with a depth-16 semaphore ring, then one f32 VPU pass.
# ---------------------------------------------------------------------------
def _hbm_gather_kernel(ids_ref, w0_hbm, w1_hbm, m_ref, out_ref,
                       rows0, rows1, sem0, sem1, *, tq, depth):
    base = pl.program_id(0) * tq

    def start_row(t, slot, rid):
        pltpu.make_async_copy(w0_hbm.at[pl.ds(rid, 1), :],
                              rows0.at[pl.ds(t, 1), :], sem0.at[slot]).start()
        pltpu.make_async_copy(w1_hbm.at[pl.ds(rid, 1), :],
                              rows1.at[pl.ds(t, 1), :], sem1.at[slot]).start()

    def wait_row(t, slot):
        # Dummy-index source: .wait() only needs the semaphore + transfer
        # size; avoids re-reading ids from SMEM on the critical path.
        pltpu.make_async_copy(w0_hbm.at[pl.ds(0, 1), :],
                              rows0.at[pl.ds(t, 1), :], sem0.at[slot]).wait()
        pltpu.make_async_copy(w1_hbm.at[pl.ds(0, 1), :],
                              rows1.at[pl.ds(t, 1), :], sem1.at[slot]).wait()

    for t in range(depth):                                    # prime the ring
        start_row(t, t, ids_ref[base + t])

    @pl.loop(0, tq)
    def _(t):
        slot = t & (depth - 1)
        nxt = t + depth
        # Read the next id BEFORE the wait (.wait() breaks sst->sld fwd).
        rid_next = ids_ref[base + jnp.minimum(nxt, tq - 1)]
        wait_row(t, slot)

        @pl.when(nxt < tq)
        def _():
            start_row(nxt, slot, rid_next)

    m = m_ref[...].astype(jnp.float32)                        # (2, D)
    acc = (rows0[...].astype(jnp.float32) * m[0:1, :]
           + rows1[...].astype(jnp.float32) * m[1:2, :])
    out_ref[...] = acc.astype(out_ref.dtype)


# ---------------------------------------------------------------------------
# Wrapper
# ---------------------------------------------------------------------------
def embeddings_with_masks(input_ids, w0, w1, mask0, mask1,
                          constrain_mode="identity",
                          *, force_path=None,
                          token_block_resident=256, token_block_gather=512):
    """Pallas implementation of the masked/merged embedding forward for two
    embedding tables; masks in 'scalar' or 'vector_input' mode."""
    assert w0.shape == w1.shape, "embedding tables must share (V, D)"
    V, D = w0.shape
    out_dtype = w0.dtype
    B, S = input_ids.shape
    N = B * S

    cm0, cm1 = _constrain([mask0, mask1], constrain_mode)
    cm0 = jnp.broadcast_to(jnp.ravel(cm0), (D,)).astype(jnp.float32)
    cm1 = jnp.broadcast_to(jnp.ravel(cm1), (D,)).astype(jnp.float32)

    # Clamp ids: TPU only bounds-checks the DMA path; OOB ids would otherwise
    # read garbage / fault.  (PyTorch would raise instead.)
    ids_flat = jnp.clip(input_ids.reshape(N).astype(jnp.int32), 0, V - 1)

    itemsize_w = jnp.dtype(w0.dtype).itemsize
    itemsize_o = jnp.dtype(out_dtype).itemsize
    sub = 8 if itemsize_o >= 4 else (16 if itemsize_o == 2 else 32)

    def _tq(pref):
        return _round_up(max(sub, min(pref, _round_up(N, sub))), sub)

    resident_budget, vmem_limit = _vmem_budgets()

    tq_res = _tq(token_block_resident)
    # Constant-index resident inputs are still double-buffered by the
    # pipeline; include out tiles + slack for temporaries.
    resident_bytes = (2 * V * D * itemsize_o
                      + 2 * tq_res * D * itemsize_o
                      + 2 * 1024 * 1024)
    onehot_bytes = resident_bytes + 2 * tq_res * max(V, 128) * itemsize_o

    path = force_path
    if path is None:
        if (itemsize_o == 2 and V <= ONEHOT_MAX_V
                and onehot_bytes <= resident_budget):
            path = "onehot"          # exact for bf16/f16 tables (1.0 * value)
        elif resident_bytes <= resident_budget:
            path = "resident"
        else:
            path = "gather"

    if path in ("onehot", "resident"):
        # Pre-merge once in the wrapper (same expression / dtype cast as the
        # reference) -> single (V, D) resident table, no cross-step scratch,
        # token axis fully parallel.
        merged = (cm0[None, :] * w0.astype(jnp.float32)
                  + cm1[None, :] * w1.astype(jnp.float32)).astype(out_dtype)
        tq = tq_res
    else:
        tq = _tq(token_block_gather)

    n_pad = _round_up(N, tq)
    ids_pad = jnp.pad(ids_flat, (0, n_pad - N))               # pad with row 0
    grid = (n_pad // tq,)

    cparams = pltpu.CompilerParams(
        dimension_semantics=("parallel",),                    # no cross-step state
        vmem_limit_bytes=vmem_limit,
    )

    if path == "onehot":
        cost = pl.CostEstimate(
            flops=2 * n_pad * V * D, transcendentals=0,
            bytes_accessed=V * D * itemsize_o + n_pad * D * itemsize_o + 4 * n_pad)
        ids2d = ids_pad.reshape(n_pad, 1)
        out_flat = pl.pallas_call(
            functools.partial(_onehot_gather_kernel, v=V),
            out_shape=jax.ShapeDtypeStruct((n_pad, D), out_dtype),
            grid=grid,
            in_specs=[pl.BlockSpec((tq, 1), lambda i: (i, 0)),     # ids (VMEM)
                      pl.BlockSpec((V, D), lambda i: (0, 0))],     # resident table
            out_specs=pl.BlockSpec((tq, D), lambda i: (i, 0)),
            compiler_params=cparams,
            cost_estimate=cost,
        )(ids2d, merged)

    elif path == "resident":
        cost = pl.CostEstimate(
            flops=n_pad * D, transcendentals=0,
            bytes_accessed=V * D * itemsize_o + 2 * n_pad * D * itemsize_o + 4 * n_pad)
        grid_spec = pltpu.PrefetchScalarGridSpec(
            num_scalar_prefetch=1,                                 # ids -> SMEM
            grid=grid,
            in_specs=[pl.BlockSpec((V, D), lambda i, ids: (0, 0))],
            out_specs=pl.BlockSpec((tq, D), lambda i, ids: (i, 0)),
        )
        out_flat = pl.pallas_call(
            functools.partial(_vmem_copy_gather_kernel, tq=tq),
            out_shape=jax.ShapeDtypeStruct((n_pad, D), out_dtype),
            grid_spec=grid_spec,
            compiler_params=cparams,
            cost_estimate=cost,
        )(ids_pad, merged)

    else:  # gather
        depth = min(16, tq)
        while depth & (depth - 1):                                 # power of two
            depth -= 1
        cost = pl.CostEstimate(
            flops=3 * n_pad * D, transcendentals=0,
            bytes_accessed=(n_pad * 2 * D * itemsize_w
                            + n_pad * D * itemsize_o + 4 * n_pad))
        m_stack = jnp.stack([cm0, cm1], axis=0)                    # (2, D) f32
        grid_spec = pltpu.PrefetchScalarGridSpec(
            num_scalar_prefetch=1,                                 # ids -> SMEM
            grid=grid,
            in_specs=[pl.BlockSpec(memory_space=pl.ANY),           # w0 in HBM
                      pl.BlockSpec(memory_space=pl.ANY),           # w1 in HBM
                      pl.BlockSpec((2, D), lambda i, ids: (0, 0))],
            out_specs=pl.BlockSpec((tq, D), lambda i, ids: (i, 0)),
            scratch_shapes=[pltpu.VMEM((tq, D), w0.dtype),
                            pltpu.VMEM((tq, D), w1.dtype),
                            pltpu.SemaphoreType.DMA((depth,)),
                            pltpu.SemaphoreType.DMA((depth,))],
        )
        out_flat = pl.pallas_call(
            functools.partial(_hbm_gather_kernel, tq=tq, depth=depth),
            out_shape=jax.ShapeDtypeStruct((n_pad, D), out_dtype),
            grid_spec=grid_spec,
            compiler_params=cparams,
            cost_estimate=cost,
        )(ids_pad, w0, w1, m_stack)

    return out_flat[:N].reshape(B, S, D)


def _reference(input_ids, w0, w1, mask0, mask1, constrain_mode="identity"):
    cm0, cm1 = _constrain([mask0, mask1], constrain_mode)
    merged = (cm0[None, :] * w0.astype(jnp.float32)
              + cm1[None, :] * w1.astype(jnp.float32)).astype(w0.dtype)
    return jnp.take(merged, input_ids, axis=0)


if __name__ == "__main__":
    # Small deterministic setup consistent with the module:
    #   2 embedding tables (V, D), masks in 'vector_input' mode (D,),
    #   constrain_mode='identity' (the module default).
    B, S = 2, 8
    V, D = 64, 128

    key = jax.random.PRNGKey(0)
    k_ids, k_w0, k_w1, k_m0, k_m1 = jax.random.split(key, 5)

    input_ids = jax.random.randint(k_ids, (B, S), 0, V, dtype=jnp.int32)
    w0 = jax.random.normal(k_w0, (V, D), dtype=jnp.float32)
    w1 = jax.random.normal(k_w1, (V, D), dtype=jnp.float32)
    mask0 = 0.5 + 0.5 * jax.random.uniform(k_m0, (D,), dtype=jnp.float32)
    mask1 = 0.5 * jax.random.uniform(k_m1, (D,), dtype=jnp.float32)

    ref = _reference(input_ids, w0, w1, mask0, mask1, "identity")

    # Resident (VMEM table, unrolled row copies) path — auto-selected for f32.
    out_res = embeddings_with_masks(input_ids, w0, w1, mask0, mask1, "identity")
    out_res = jax.block_until_ready(out_res)
    assert out_res.shape == (B, S, D)
    assert jnp.allclose(out_res, ref, atol=1e-5, rtol=1e-5)

    # General (manual HBM row-DMA ring) path — forced for coverage.
    out_gat = embeddings_with_masks(input_ids, w0, w1, mask0, mask1, "identity",
                                    force_path="gather")
    out_gat = jax.block_until_ready(out_gat)
    assert out_gat.shape == (B, S, D)
    assert jnp.allclose(out_gat, ref, atol=1e-5, rtol=1e-5)

    # One-hot MXU gather path — bf16 tables (exact: each product is 1.0*value).
    w0_bf, w1_bf = w0.astype(jnp.bfloat16), w1.astype(jnp.bfloat16)
    ref_bf = _reference(input_ids, w0_bf, w1_bf, mask0, mask1, "identity")
    out_oh = embeddings_with_masks(input_ids, w0_bf, w1_bf, mask0, mask1,
                                   "identity", force_path="onehot")
    out_oh = jax.block_until_ready(out_oh)
    assert out_oh.shape == (B, S, D)
    assert jnp.allclose(out_oh.astype(jnp.float32), ref_bf.astype(jnp.float32),
                        atol=1e-6, rtol=1e-6)

    print("KERNEL_OK")
</pallas_src>

<mosaic_0001>
module attributes {stable_mosaic.version = 11 : i64} {
  func.func @_vmem_copy_gather_kernel(%arg0: i32, %arg1: memref<16xi32, #tpu.memory_space<smem>>, %arg2: memref<64x128xf32, #tpu.memory_space<vmem>>, %arg3: memref<16x128xf32, #tpu.memory_space<vmem>>) attributes {dimension_semantics = [#tpu.dimension_semantics<parallel>], iteration_bounds = array<i64: 1>, scalar_prefetch = 1 : i64, scratch_operands = 0 : i64, tpu.core_type = #tpu.core_type<tc>, window_params = [{pipeline_mode = #tpu.pipeline_mode<synchronous>, transform_indices = @transform_0, window_bounds = array<i64: 64, 128>}, {transform_indices = @transform_1, window_bounds = array<i64: 16, 128>}]} {
    %c16_i32 = arith.constant 16 : i32
    %0 = arith.muli %arg0, %c16_i32 : i32
    %c0_i32 = arith.constant 0 : i32
    %c2_i32 = arith.constant 2 : i32
    %1 = arith.addi %c0_i32, %c2_i32 : i32
    %c1_i32 = arith.constant 1 : i32
    scf.for %arg4 = %c0_i32 to %1 step %c1_i32  : i32 {
      %c8_i32 = arith.constant 8 : i32
      %2 = arith.muli %arg4, %c8_i32 : i32
      %3 = tpu.assume_multiple %2, 8 : i32
      %c0_i32_1 = arith.constant 0 : i32
      %4 = arith.addi %3, %c0_i32_1 : i32
      %5 = arith.addi %0, %4 : i32
      %6 = arith.index_cast %5 : i32 to index
      %7 = memref.load %arg1[%6] : memref<16xi32, #tpu.memory_space<smem>>
      %8 = arith.index_cast %7 : i32 to index
      %c0 = arith.constant 0 : index
      %9 = vector.load %arg2[%8, %c0] : memref<64x128xf32, #tpu.memory_space<vmem>>, vector<1x128xf32>
      %10 = arith.index_cast %4 : i32 to index
      %c0_2 = arith.constant 0 : index
      %11 = vector.load %arg3[%10, %c0_2] : memref<16x128xf32, #tpu.memory_space<vmem>>, vector<1x128xf32>
      tpu.vector_store %arg3[%10, %c0_2], %9 {strides = array<i32>} : memref<16x128xf32, #tpu.memory_space<vmem>>, vector<1x128xf32>,
      %c1_i32_3 = arith.constant 1 : i32
      %12 = arith.addi %3, %c1_i32_3 : i32
      %13 = arith.addi %0, %12 : i32
      %14 = arith.index_cast %13 : i32 to index
      %15 = memref.load %arg1[%14] : memref<16xi32, #tpu.memory_space<smem>>
      %16 = arith.index_cast %15 : i32 to index
      %c0_4 = arith.constant 0 : index
      %17 = vector.load %arg2[%16, %c0_4] : memref<64x128xf32, #tpu.memory_space<vmem>>, vector<1x128xf32>
      %18 = arith.index_cast %12 : i32 to index
      %c0_5 = arith.constant 0 : index
      %19 = vector.load %arg3[%18, %c0_5] : memref<16x128xf32, #tpu.memory_space<vmem>>, vector<1x128xf32>
      tpu.vector_store %arg3[%18, %c0_5], %17 {strides = array<i32>} : memref<16x128xf32, #tpu.memory_space<vmem>>, vector<1x128xf32>,
      %c2_i32_6 = arith.constant 2 : i32
      %20 = arith.addi %3, %c2_i32_6 : i32
      %21 = arith.addi %0, %20 : i32
      %22 = arith.index_cast %21 : i32 to index
      %23 = memref.load %arg1[%22] : memref<16xi32, #tpu.memory_space<smem>>
      %24 = arith.index_cast %23 : i32 to index
      %c0_7 = arith.constant 0 : index
      %25 = vector.load %arg2[%24, %c0_7] : memref<64x128xf32, #tpu.memory_space<vmem>>, vector<1x128xf32>
      %26 = arith.index_cast %20 : i32 to index
      %c0_8 = arith.constant 0 : index
      %27 = vector.load %arg3[%26, %c0_8] : memref<16x128xf32, #tpu.memory_space<vmem>>, vector<1x128xf32>
      tpu.vector_store %arg3[%26, %c0_8], %25 {strides = array<i32>} : memref<16x128xf32, #tpu.memory_space<vmem>>, vector<1x128xf32>,
      %c3_i32 = arith.constant 3 : i32
      %28 = arith.addi %3, %c3_i32 : i32
      %29 = arith.addi %0, %28 : i32
      %30 = arith.index_cast %29 : i32 to index
      %31 = memref.load %arg1[%30] : memref<16xi32, #tpu.memory_space<smem>>
      %32 = arith.index_cast %31 : i32 to index
      %c0_9 = arith.constant 0 : index
      %33 = vector.load %arg2[%32, %c0_9] : memref<64x128xf32, #tpu.memory_space<vmem>>, vector<1x128xf32>
      %34 = arith.index_cast %28 : i32 to index
      %c0_10 = arith.constant 0 : index
      %35 = vector.load %arg3[%34, %c0_10] : memref<16x128xf32, #tpu.memory_space<vmem>>, vector<1x128xf32>
      tpu.vector_store %arg3[%34, %c0_10], %33 {strides = array<i32>} : memref<16x128xf32, #tpu.memory_space<vmem>>, vector<1x128xf32>,
      %c4_i32 = arith.constant 4 : i32
      %36 = arith.addi %3, %c4_i32 : i32
      %37 = arith.addi %0, %36 : i32
      %38 = arith.index_cast %37 : i32 to index
      %39 = memref.load %arg1[%38] : memref<16xi32, #tpu.memory_space<smem>>
      %40 = arith.index_cast %39 : i32 to index
      %c0_11 = arith.constant 0 : index
      %41 = vector.load %arg2[%40, %c0_11] : memref<64x128xf32, #tpu.memory_space<vmem>>, vector<1x128xf32>
      %42 = arith.index_cast %36 : i32 to index
      %c0_12 = arith.constant 0 : index
      %43 = vector.load %arg3[%42, %c0_12] : memref<16x128xf32, #tpu.memory_space<vmem>>, vector<1x128xf32>
      tpu.vector_store %arg3[%42, %c0_12], %41 {strides = array<i32>} : memref<16x128xf32, #tpu.memory_space<vmem>>, vector<1x128xf32>,
      %c5_i32 = arith.constant 5 : i32
      %44 = arith.addi %3, %c5_i32 : i32
      %45 = arith.addi %0, %44 : i32
      %46 = arith.index_cast %45 : i32 to index
      %47 = memref.load %arg1[%46] : memref<16xi32, #tpu.memory_space<smem>>
      %48 = arith.index_cast %47 : i32 to index
      %c0_13 = arith.constant 0 : index
      %49 = vector.load %arg2[%48, %c0_13] : memref<64x128xf32, #tpu.memory_space<vmem>>, vector<1x128xf32>
      %50 = arith.index_cast %44 : i32 to index
      %c0_14 = arith.constant 0 : index
      %51 = vector.load %arg3[%50, %c0_14] : memref<16x128xf32, #tpu.memory_space<vmem>>, vector<1x128xf32>
      tpu.vector_store %arg3[%50, %c0_14], %49 {strides = array<i32>} : memref<16x128xf32, #tpu.memory_space<vmem>>, vector<1x128xf32>,
      %c6_i32 = arith.constant 6 : i32
      %52 = arith.addi %3, %c6_i32 : i32
      %53 = arith.addi %0, %52 : i32
      %54 = arith.index_cast %53 : i32 to index
      %55 = memref.load %arg1[%54] : memref<16xi32, #tpu.memory_space<smem>>
      %56 = arith.index_cast %55 : i32 to index
      %c0_15 = arith.constant 0 : index
      %57 = vector.load %arg2[%56, %c0_15] : memref<64x128xf32, #tpu.memory_space<vmem>>, vector<1x128xf32>
      %58 = arith.index_cast %52 : i32 to index
      %c0_16 = arith.constant 0 : index
      %59 = vector.load %arg3[%58, %c0_16] : memref<16x128xf32, #tpu.memory_space<vmem>>, vector<1x128xf32>
      tpu.vector_store %arg3[%58, %c0_16], %57 {strides = array<i32>} : memref<16x128xf32, #tpu.memory_space<vmem>>, vector<1x128xf32>,
      %c7_i32 = arith.constant 7 : i32
      %60 = arith.addi %3, %c7_i32 : i32
      %61 = arith.addi %0, %60 : i32
      %62 = arith.index_cast %61 : i32 to index
      %63 = memref.load %arg1[%62] : memref<16xi32, #tpu.memory_space<smem>>
      %64 = arith.index_cast %63 : i32 to index
      %c0_17 = arith.constant 0 : index
      %65 = vector.load %arg2[%64, %c0_17] : memref<64x128xf32, #tpu.memory_space<vmem>>, vector<1x128xf32>
      %66 = arith.index_cast %60 : i32 to index
      %c0_18 = arith.constant 0 : index
      %67 = vector.load %arg3[%66, %c0_18] : memref<16x128xf32, #tpu.memory_space<vmem>>, vector<1x128xf32>
      tpu.vector_store %arg3[%66, %c0_18], %65 {strides = array<i32>} : memref<16x128xf32, #tpu.memory_space<vmem>>, vector<1x128xf32>,
    }
    %c2_i32_0 = arith.constant 2 : i32
    return
  }
  func.func @transform_0(%arg0: i32, %arg1: memref<16xi32, #tpu.memory_space<smem>>) -> (i32, i32) {
    %c0_i32 = arith.constant 0 : i32
    %c0_i32_0 = arith.constant 0 : i32
    %c0_i32_1 = arith.constant 0 : i32
    return %c0_i32, %c0_i32_0 : i32, i32
  }
  func.func @transform_1(%arg0: i32, %arg1: memref<16xi32, #tpu.memory_space<smem>>) -> (i32, i32) {
    %c0_i32 = arith.constant 0 : i32
    %c0_i32_0 = arith.constant 0 : i32
    return %arg0, %c0_i32 : i32, i32
  }
}

</mosaic_0001>

<bundles_post_ra>
// kernel: tpu_custom_call.1
= control target key start
LH: loop header
LB: loop body
LE: loop exit
PB: predicated region body
PF: predicated region fallthrough
CT: control target
= control target key end

     0   :  { %s311_s0 = inlined_call_operand.hbm [shape: s32[16], index: 0, kind: input, shape index: {}]   ;;  %s312_s1 = inlined_call_operand.hbm [shape: f32[64,128], index: 1, kind: input, shape index: {}]   ;;  %s313_s2 = inlined_call_operand.hbm [shape: f32[16,128], index: 2, kind: output, shape index: {}]  }
   0x1   :  { %s172_s11 = scalar_lea.hbm %s311_s0, 16 }
   0x2   :  { %p173_p0 = scmp.ne.s32.totalorder %s311_s0, %s172_s11  ;;  %p176_p1 = scmp.lt.u32.totalorder %s172_s11, %s311_s0 }
   0x4   :  { %p178_p2 = pnand %p176_p1, %p173_p0 }
   0x6   :  { %181 = shalt.err (!%p178_p2)  }
   0x7   :  { %s240_s16 = smov [#allocation3]  }
   0x8   :  { %8 = dma.hbm_to_smem %s311_s0, 16, %s240_s16, [#allocation2] }
   0x9   :  { %230 = dma.done.wait [#allocation2], 16 }
   0xa   :  { %231 = vsyncadd [#allocation2], 4294967280 }
   0xb   :  { %10 = sfence }
   0xc   :  { %11 = vsyncpa [#allocation5], 0 }
   0xd   :  { %12 = vsyncpa [#allocation6], 0  ;;  %s241_s19 = smov [#allocation4]   ;;  %s182_s23 = scalar_lea.hbm %s312_s1, 1024 }
   0xe   :  { %s18_s20 = sshll.u32 %s241_s19, 4  ;;  %p183_p3 = scmp.ne.s32.totalorder %s312_s1, %s182_s23  ;;  %s19_s20 = int_to_ptr.vmem [resolvable:$true] %s18_s20 }
   0xf   :  { %p186_p4 = scmp.lt.u32.totalorder %s182_s23, %s312_s1 }
  0x11   :  { %p188_p5 = pnand %p186_p4, %p183_p3 }
  0x13   :  { %191 = shalt.err (!%p188_p5)
}
  0x14   :  { %s192_s0 = scalar_lea.vmem %s19_s20, 1024  ;;  %p197_p7 = scmp.lt.s32.totalorder %s19_s20, %s19_s20 }
  0x15   :  { %p193_p6 = scmp.ne.s32.totalorder %s19_s20, %s192_s0  ;;  %p198_p8 = scmp.lt.s32.totalorder %s192_s0, %s192_s0 }
  0x17   :  { %p199_p9 = por %p198_p8, %p197_p7 }
  0x19   :  { %p200_p10 = pnand %p199_p9, %p193_p6 }
  0x1b   :  { %203 = shalt.err (!%p200_p10)
}
  0x1c   :  { %s242_s28 = smov 128   ;;  %s243_s29 = smov 8  }
  0x1d   :  { %24 = dma.hbm_to_vmem [thread:$0]  %s312_s1, 1024, %s19_s20, [#allocation5], %s242_s28, %s242_s28, %s243_s29  }
  0x1e   :  { %232 = dma.done.wait [#allocation5], 1024  }
  0x1f   :  { %233 = vsyncadd [#allocation5], 4294966272  ;;  %s287_s4 = smov 0  }
  0x20 LB: > { %s144_s5 = sshll.u32 %s238_s4, 3  ;;  %s34_s4 = sadd.s32 1, %s238_s4   ;;  %s238_s4 = sphi %s287_s4, %s34_s4  }
  0x21   : > { %s37_s6 = sld [smem:[#allocation3 + %s144_s5]]  ;;  %s42_s7 = sadd.s32 1, %s144_s5 }
  0x22   : > { %s49_s8 = sadd.s32 2, %s144_s5  ;;  %s44_s9 = sld [smem:[#allocation3 + %s42_s7]] }
  0x23   : > { %s51_s10 = sld [smem:[#allocation3 + %s49_s8]]  ;;  %s56_s11 = sadd.s32 3, %s144_s5 }
  0x24   : > { %s63_s12 = sadd.s32 4, %s144_s5  ;;  %s58_s13 = sld [smem:[#allocation3 + %s56_s11]] }
  0x25   : > { %s65_s1 = sld [smem:[#allocation3 + %s63_s12]]  ;;  %s70_s14 = sadd.s32 5, %s144_s5 }
  0x26   : > { %s77_s15 = sadd.s32 6, %s144_s5  ;;  %s72_s16 = sld [smem:[#allocation3 + %s70_s14]] }
  0x27   : > { %s38_s17 = scalar_lea.vmem [#allocation4], %s37_s6  ;;  %s79_s18 = sld [smem:[#allocation3 + %s77_s15]] }
  0x28   : > { %v39_v0 = vld [vmem:[%s38_s17] sm:$0x1]  ;;  %s84_s19 = sadd.s32 7, %s144_s5  ;;  %s40_s20 = scalar_lea.vmem [#allocation7], %s144_s5 }
  0x29   : > { %41 = vst [vmem:[%s40_s20] sm:$0x1] %v39_v0  ;;  %s45_s21 = scalar_lea.vmem [#allocation4], %s44_s9  ;;  %s52_s22 = scalar_lea.vmem [#allocation4], %s51_s10 }
  0x2a   : > { %v46_v1 = vld [vmem:[%s45_s21] sm:$0x1]  ;;  %s86_s23 = sld [smem:[#allocation3 + %s84_s19]]  ;;  %s59_s24 = scalar_lea.vmem [#allocation4], %s58_s13 }
  0x2b   : > { %v53_v2 = vld [vmem:[%s52_s22] sm:$0x1]  ;;  %146 = vst [vmem:[%s40_s20 + $0x1] sm:$0x1] %v46_v1  ;;  %s66_s25 = scalar_lea.vmem [#allocation4], %s65_s1  ;;  %p31_p11 = scmp.ge.s32.totalorder %s34_s4, 2  }
  0x2c   : > { %148 = vst [vmem:[%s40_s20 + $0x2] sm:$0x1] %v53_v2  ;;  %v60_v3 = vld [vmem:[%s59_s24] sm:$0x1]  ;;  %s73_s26 = scalar_lea.vmem [#allocation4], %s72_s16  ;;  %s244_s30 = smov (%p31_p11), [#allocation7]  }
  0x2d   : > { %v67_v4 = vld [vmem:[%s66_s25] sm:$0x1]  ;;  %150 = vst [vmem:[%s40_s20 + $0x3] sm:$0x1] %v60_v3  ;;  %s80_s27 = scalar_lea.vmem [#allocation4], %s79_s18  ;;  %33 = sbr.rel (!%p31_p11) target bundleno = 32 (0x20), region = 51 }
  0x2e   : > { %152 = vst [vmem:[%s40_s20 + $0x4] sm:$0x1] %v67_v4  ;;  %v74_v5 = vld [vmem:[%s73_s26] sm:$0x1]  ;;  %s96_s3 = sshll.u32 (%p31_p11), %s244_s30, 4  ;;  %s97_s3 = int_to_ptr.vmem [resolvable:$true] %s96_s3 }
  0x2f   : > { %154 = vst [vmem:[%s40_s20 + $0x5] sm:$0x1] %v74_v5  ;;  %v81_v6 = vld [vmem:[%s80_s27] sm:$0x1]  ;;  %s204_s5 = scalar_lea.vmem (%p31_p11), %s97_s3, 256  ;;  %p209_p13 = scmp.lt.s32.totalorder (%p31_p11), %s97_s3, %s97_s3 }
  0x30   : > { %156 = vst [vmem:[%s40_s20 + $0x6] sm:$0x1] %v81_v6  ;;  %s87_s0 = scalar_lea.vmem [#allocation4], %s86_s23  ;;  %p205_p12 = scmp.ne.s32.totalorder (%p31_p11), %s97_s3, %s204_s5 }
  0x31   : > { %v88_v7 = vld [vmem:[%s87_s0] sm:$0x1]  ;;  %p210_p0 = scmp.lt.s32.totalorder (%p31_p11), %s204_s5, %s204_s5 }
  0x32   : > { %158 = vst [vmem:[%s40_s20 + $0x7] sm:$0x1] %v88_v7 }
  0x33   :  { %p211_p1 = por (%p31_p11), %p210_p0, %p209_p13 }
  0x35   :  { %p212_p2 = pnand %p211_p1, %p205_p12 }
  0x37   :  { %215 = shalt.err (!%p212_p2)
}
  0x38   :  { %s216_s8 = scalar_lea.hbm %s313_s2, 256 }
  0x39   :  { %p217_p3 = scmp.ne.s32.totalorder %s313_s2, %s216_s8  ;;  %p220_p4 = scmp.lt.u32.totalorder %s216_s8, %s313_s2 }
  0x3b   :  { %p222_p5 = pnand %p220_p4, %p217_p3 }
  0x3d   :  { %225 = shalt.err (!%p222_p5)
}
  0x3e   :  { %102 = dma.vmem_to_hbm [thread:$0]  %s97_s3, 256, %s313_s2, [#allocation6], %s242_s28, %s242_s28, %s243_s29  }
  0x3f   :  { %234 = dma.done.wait [#allocation6], 256  }
  0x40   :  { %235 = vsyncadd [#allocation6], 4294967040 }
  0x41   :  { %106 = vsyncpa [#allocation5], 1 }
  0x42   :  { %107 = vsyncpa [#allocation6], 1 }

</bundles_post_ra>
